<compile_context>
chip_gen: v7x
topology: tpu7x:2x2x1
jax: 0.10.0
libtpu: 0.0.40
codegen_flags: <defaults>
</compile_context>

<pallas_src>
import functools

import jax
import jax.numpy as jnp
from jax.experimental import pallas as pl
from jax.experimental.pallas import tpu as pltpu


def _mlp_kernel(x_ref, w1_ref, b1_ref, w2_ref, b2_ref, w3_ref, b3_ref, o_ref):
    # Weights arrive pre-cast to bf16 and stay resident across all grid steps.
    x = x_ref[...].astype(jnp.bfloat16)

    # layer 1: Linear(n_in, H) + Tanh   (bf16 operands, f32 accumulation)
    h = jnp.dot(x, w1_ref[...], preferred_element_type=jnp.float32) + b1_ref[...]
    h = jnp.tanh(h)

    # layer 2: Linear(H, H) + Tanh      (n_hidden_layers=2 -> one extra hidden linear)
    h = jnp.dot(h.astype(jnp.bfloat16), w2_ref[...],
                preferred_element_type=jnp.float32) + b2_ref[...]
    h = jnp.tanh(h)

    # output layer: Linear(H, n_out), no activation; store only the real columns.
    y = jnp.dot(h.astype(jnp.bfloat16), w3_ref[...],
                preferred_element_type=jnp.float32) + b3_ref[...]
    o_ref[...] = y.astype(o_ref.dtype)


def _round_up(a, b):
    return (a + b - 1) // b * b


@functools.partial(jax.jit, static_argnames=("tile_b",))
def feed_forward_nn_pallas(x, w1, b1, w2, b2, w3, b3, *, tile_b=2048):
    batch, n_in = x.shape
    hidden = w1.shape[1]
    n_out = w3.shape[1]

    # bf16 MXU operands (f32 accumulation inside the kernel); biases stay f32.
    w1b = w1.astype(jnp.bfloat16)
    w2b = w2.astype(jnp.bfloat16)
    w3b = w3.astype(jnp.bfloat16)

    # Batch tile: multiple of 8 sublanes, capped so the grid has >= 2 steps whenever
    # batch allows (lets "parallel" shard across v7x's two TensorCores).
    half = _round_up(pl.cdiv(batch, 2), 8)
    tb = max(8, min(_round_up(tile_b, 8), half))
    grid = (pl.cdiv(batch, tb),)   # partial trailing block handled by Pallas (masked writes)

    # Rough per-step VMEM footprint (x/out tiles lane-padded to 128, double-buffered,
    # plus f32 hidden temporaries).  Only raise the scoped-VMEM limit if we exceed the
    # smallest per-generation default (16 MiB on v5e); keep headroom under v7x's 64 MiB.
    vmem_est = tb * 128 * 4 * 8
    vmem_limit = None
    if vmem_est > (12 << 20):
        vmem_limit = min(vmem_est + (16 << 20), 48 << 20)

    # Advisory cost hint: this kernel is memory-bound; let XLA schedule around it.
    cost = pl.CostEstimate(
        flops=2 * batch * (n_in * hidden + hidden * hidden + hidden * n_out),
        transcendentals=2 * batch * hidden,
        bytes_accessed=batch * 4 * (n_in + n_out)
        + 2 * (n_in * hidden + hidden * hidden + hidden * n_out)
        + 4 * (2 * hidden + n_out),
    )

    # Weights/biases: full block, constant index -> DMA'd once, resident in VMEM.
    def resident(a):
        return pl.BlockSpec(a.shape, lambda i: (0, 0))

    out = pl.pallas_call(
        _mlp_kernel,
        out_shape=jax.ShapeDtypeStruct((batch, n_out), jnp.float32),
        grid=grid,
        in_specs=[
            pl.BlockSpec((tb, n_in), lambda i: (i, 0)),   # stream x over the batch
            resident(w1b), resident(b1),
            resident(w2b), resident(b2),
            resident(w3b), resident(b3),
        ],
        out_specs=pl.BlockSpec((tb, n_out), lambda i: (i, 0)),
        compiler_params=pltpu.CompilerParams(
            dimension_semantics=("parallel",),            # megacore sharding on v7x
            vmem_limit_bytes=vmem_limit,
        ),
        cost_estimate=cost,
    )(x, w1b, b1, w2b, b2, w3b, b3)

    return out


def init_params(key, n_in=6, n_out=5, n_nodes_per_layer=64):
    """Weights ~ U(-1/sqrt(fan_in), 1/sqrt(fan_in)) like torch.nn.Linear default;
    biases zero, matching nn.init.constant_(m.bias, val=0) in the module."""
    k1, k2, k3 = jax.random.split(key, 3)

    def linear_w(k, fan_in, fan_out):
        bound = 1.0 / jnp.sqrt(fan_in)
        return jax.random.uniform(k, (fan_in, fan_out), jnp.float32, -bound, bound)

    w1 = linear_w(k1, n_in, n_nodes_per_layer)
    b1 = jnp.zeros((1, n_nodes_per_layer), jnp.float32)
    w2 = linear_w(k2, n_nodes_per_layer, n_nodes_per_layer)
    b2 = jnp.zeros((1, n_nodes_per_layer), jnp.float32)
    w3 = linear_w(k3, n_nodes_per_layer, n_out)
    b3 = jnp.zeros((1, n_out), jnp.float32)
    return w1, b1, w2, b2, w3, b3


def reference_mlp(x, w1, b1, w2, b2, w3, b3):
    h = jnp.tanh(x @ w1 + b1)
    h = jnp.tanh(h @ w2 + b2)
    return h @ w3 + b3


if __name__ == "__main__":
    key = jax.random.PRNGKey(0)
    kx, kp = jax.random.split(key)

    batch, n_in, n_out, hidden = 256, 6, 5, 64
    x = jax.random.normal(kx, (batch, n_in), jnp.float32)
    params = init_params(kp, n_in=n_in, n_out=n_out, n_nodes_per_layer=hidden)

    # Even batch: 2 full tiles (tb=128), exercises the megacore-friendly split.
    out = feed_forward_nn_pallas(x, *params)
    out = jax.block_until_ready(out)
    ref = reference_mlp(x, *params)
    assert out.shape == (batch, n_out), out.shape
    # bf16 matmul operands with f32 accumulation -> ~1e-3-level differences vs f32 ref.
    assert jnp.allclose(out, ref, atol=3e-2, rtol=3e-2), "mismatch vs reference (even batch)"

    # Ragged batch: exercises the partial trailing block (no wrapper zero-pad copy).
    x_r = x[:100]
    out_r = jax.block_until_ready(feed_forward_nn_pallas(x_r, *params))
    ref_r = reference_mlp(x_r, *params)
    assert out_r.shape == (100, n_out), out_r.shape
    assert jnp.allclose(out_r, ref_r, atol=3e-2, rtol=3e-2), "mismatch vs reference (ragged batch)"

    print("KERNEL_OK")
</pallas_src>

<mosaic_0001>
module attributes {stable_mosaic.version = 11 : i64} {
  func.func @_mlp_kernel(%arg0: i32, %arg1: memref<128x6xf32, #tpu.memory_space<vmem>>, %arg2: memref<6x64xbf16, #tpu.memory_space<vmem>>, %arg3: memref<1x64xf32, #tpu.memory_space<vmem>>, %arg4: memref<64x64xbf16, #tpu.memory_space<vmem>>, %arg5: memref<1x64xf32, #tpu.memory_space<vmem>>, %arg6: memref<64x5xbf16, #tpu.memory_space<vmem>>, %arg7: memref<1x5xf32, #tpu.memory_space<vmem>>, %arg8: memref<128x5xf32, #tpu.memory_space<vmem>>) attributes {dimension_semantics = [#tpu.dimension_semantics<parallel>], iteration_bounds = array<i64: 2>, scalar_prefetch = 0 : i64, scratch_operands = 0 : i64, tpu.core_type = #tpu.core_type<tc>, window_params = [{transform_indices = @transform_0, window_bounds = array<i64: 128, 6>}, {pipeline_mode = #tpu.pipeline_mode<synchronous>, transform_indices = @transform_1, window_bounds = array<i64: 6, 64>}, {pipeline_mode = #tpu.pipeline_mode<synchronous>, transform_indices = @transform_2, window_bounds = array<i64: 1, 64>}, {pipeline_mode = #tpu.pipeline_mode<synchronous>, transform_indices = @transform_3, window_bounds = array<i64: 64, 64>}, {pipeline_mode = #tpu.pipeline_mode<synchronous>, transform_indices = @transform_4, window_bounds = array<i64: 1, 64>}, {pipeline_mode = #tpu.pipeline_mode<synchronous>, transform_indices = @transform_5, window_bounds = array<i64: 64, 5>}, {pipeline_mode = #tpu.pipeline_mode<synchronous>, transform_indices = @transform_6, window_bounds = array<i64: 1, 5>}, {transform_indices = @transform_7, window_bounds = array<i64: 128, 5>}]} {
    %c0 = arith.constant 0 : index
    %c0_0 = arith.constant 0 : index
    %0 = vector.load %arg1[%c0, %c0_0] : memref<128x6xf32, #tpu.memory_space<vmem>>, vector<128x6xf32>
    %1 = arith.truncf %0 : vector<128x6xf32> to vector<128x6xbf16>
    %c0_1 = arith.constant 0 : index
    %c0_2 = arith.constant 0 : index
    %2 = vector.load %arg2[%c0_1, %c0_2] : memref<6x64xbf16, #tpu.memory_space<vmem>>, vector<6x64xbf16>
    %cst = arith.constant dense<0.000000e+00> : vector<128x64xf32>
    %3 = tpu.matmul %1, %2, %cst {dimension_numbers = #tpu.dot_dimension_numbers<[1], [0], [0], [1], [0, 0, 1, 1], [], []>} : vector<128x6xbf16>, vector<6x64xbf16>, vector<128x64xf32> -> vector<128x64xf32>
    %c0_3 = arith.constant 0 : index
    %c0_4 = arith.constant 0 : index
    %4 = vector.load %arg3[%c0_3, %c0_4] : memref<1x64xf32, #tpu.memory_space<vmem>>, vector<1x64xf32>
    %5 = vector.broadcast %4 : vector<1x64xf32> to vector<128x64xf32>
    %6 = arith.addf %3, %5 : vector<128x64xf32>
    %7 = math.tanh %6 : vector<128x64xf32>
    %8 = arith.truncf %7 : vector<128x64xf32> to vector<128x64xbf16>
    %c0_5 = arith.constant 0 : index
    %c0_6 = arith.constant 0 : index
    %9 = vector.load %arg4[%c0_5, %c0_6] : memref<64x64xbf16, #tpu.memory_space<vmem>>, vector<64x64xbf16>
    %cst_7 = arith.constant dense<0.000000e+00> : vector<128x64xf32>
    %10 = tpu.matmul %8, %9, %cst_7 {dimension_numbers = #tpu.dot_dimension_numbers<[1], [0], [0], [1], [0, 0, 1, 1], [], []>} : vector<128x64xbf16>, vector<64x64xbf16>, vector<128x64xf32> -> vector<128x64xf32>
    %c0_8 = arith.constant 0 : index
    %c0_9 = arith.constant 0 : index
    %11 = vector.load %arg5[%c0_8, %c0_9] : memref<1x64xf32, #tpu.memory_space<vmem>>, vector<1x64xf32>
    %12 = vector.broadcast %11 : vector<1x64xf32> to vector<128x64xf32>
    %13 = arith.addf %10, %12 : vector<128x64xf32>
    %14 = math.tanh %13 : vector<128x64xf32>
    %15 = arith.truncf %14 : vector<128x64xf32> to vector<128x64xbf16>
    %c0_10 = arith.constant 0 : index
    %c0_11 = arith.constant 0 : index
    %16 = vector.load %arg6[%c0_10, %c0_11] : memref<64x5xbf16, #tpu.memory_space<vmem>>, vector<64x5xbf16>
    %cst_12 = arith.constant dense<0.000000e+00> : vector<128x5xf32>
    %17 = tpu.matmul %15, %16, %cst_12 {dimension_numbers = #tpu.dot_dimension_numbers<[1], [0], [0], [1], [0, 0, 1, 1], [], []>} : vector<128x64xbf16>, vector<64x5xbf16>, vector<128x5xf32> -> vector<128x5xf32>
    %c0_13 = arith.constant 0 : index
    %c0_14 = arith.constant 0 : index
    %18 = vector.load %arg7[%c0_13, %c0_14] : memref<1x5xf32, #tpu.memory_space<vmem>>, vector<1x5xf32>
    %19 = vector.broadcast %18 : vector<1x5xf32> to vector<128x5xf32>
    %20 = arith.addf %17, %19 : vector<128x5xf32>
    %c0_15 = arith.constant 0 : index
    %c0_16 = arith.constant 0 : index
    %21 = vector.load %arg8[%c0_15, %c0_16] : memref<128x5xf32, #tpu.memory_space<vmem>>, vector<128x5xf32>
    tpu.vector_store %arg8[%c0_15, %c0_16], %20 {strides = array<i32>} : memref<128x5xf32, #tpu.memory_space<vmem>>, vector<128x5xf32>,
    return
  }
  func.func @transform_0(%arg0: i32) -> (i32, i32) {
    %c0_i32 = arith.constant 0 : i32
    %c0_i32_0 = arith.constant 0 : i32
    return %arg0, %c0_i32 : i32, i32
  }
  func.func @transform_1(%arg0: i32) -> (i32, i32) {
    %c0_i32 = arith.constant 0 : i32
    %c0_i32_0 = arith.constant 0 : i32
    %c0_i32_1 = arith.constant 0 : i32
    return %c0_i32, %c0_i32_0 : i32, i32
  }
  func.func @transform_2(%arg0: i32) -> (i32, i32) {
    %c0_i32 = arith.constant 0 : i32
    %c0_i32_0 = arith.constant 0 : i32
    %c0_i32_1 = arith.constant 0 : i32
    return %c0_i32, %c0_i32_0 : i32, i32
  }
  func.func @transform_3(%arg0: i32) -> (i32, i32) {
    %c0_i32 = arith.constant 0 : i32
    %c0_i32_0 = arith.constant 0 : i32
    %c0_i32_1 = arith.constant 0 : i32
    return %c0_i32, %c0_i32_0 : i32, i32
  }
  func.func @transform_4(%arg0: i32) -> (i32, i32) {
    %c0_i32 = arith.constant 0 : i32
    %c0_i32_0 = arith.constant 0 : i32
    %c0_i32_1 = arith.constant 0 : i32
    return %c0_i32, %c0_i32_0 : i32, i32
  }
  func.func @transform_5(%arg0: i32) -> (i32, i32) {
    %c0_i32 = arith.constant 0 : i32
    %c0_i32_0 = arith.constant 0 : i32
    %c0_i32_1 = arith.constant 0 : i32
    return %c0_i32, %c0_i32_0 : i32, i32
  }
  func.func @transform_6(%arg0: i32) -> (i32, i32) {
    %c0_i32 = arith.constant 0 : i32
    %c0_i32_0 = arith.constant 0 : i32
    %c0_i32_1 = arith.constant 0 : i32
    return %c0_i32, %c0_i32_0 : i32, i32
  }
  func.func @transform_7(%arg0: i32) -> (i32, i32) {
    %c0_i32 = arith.constant 0 : i32
    %c0_i32_0 = arith.constant 0 : i32
    return %arg0, %c0_i32 : i32, i32
  }
}

</mosaic_0001>

<bundles_post_ra>
// kernel: feed_forward_nn_pallas.1
= control target key start
LH: loop header
LB: loop body
LE: loop exit
PB: predicated region body
PF: predicated region fallthrough
CT: control target
= control target key end

     0   :  { %s1160_s24 = smov 0   ;;  %s1278_s0 = inlined_call_operand.vmem [shape: f32[256,6], index: 0, kind: input, shape index: {}]   ;;  %s1279_s1 = inlined_call_operand.vmem [shape: bf16[6,64], index: 1, kind: input, shape index: {}]   ;;  %s1280_s2 = inlined_call_operand.vmem [shape: f32[1,64], index: 2, kind: input, shape index: {}]   ;;  %s1281_s3 = inlined_call_operand.vmem [shape: bf16[64,64], index: 3, kind: input, shape index: {}]   ;;  %s1282_s4 = inlined_call_operand.vmem [shape: f32[1,64], index: 4, kind: input, shape index: {}]   ;;  %s1283_s5 = inlined_call_operand.vmem [shape: bf16[64,5], index: 5, kind: input, shape index: {}]   ;;  %s1284_s6 = inlined_call_operand.vmem [shape: f32[1,5], index: 6, kind: input, shape index: {}]   ;;  %s1285_s7 = inlined_call_operand.vmem [shape: f32[256,5], index: 7, kind: output, shape index: {}]  }
   0x1 LB: > { %s883_s25 = sadd.s32 4294967295, %s1118_s24   ;;  %p887_p0 = scmp.ge.s32.totalorder %s1118_s24, 1  ;;  %s1118_s24 = sphi %s1160_s24, %s17_s24  }
   0x2   : > { %p238_p1 = scmp.lt.s32.totalorder %s1118_s24, 3 }
   0x4   : > { %p239_p2 = pnand %p887_p0, %p238_p1 }
   0x5   : > { %v307_v0 = vld [vmem:[%s1279_s1] sm:$0x7] (!%p239_p2)  ;;  %vm340_vm0 = vcmask (!%p239_p2), 1042432   ;;  %s888_s28 = sshll.u32 (!%p239_p2), %s883_s25, 4  ;;  %vm315_vm1 = vcmask (!%p239_p2), 48128   ;;  %v1041_v27 = vld [vmem:[%s1281_s3 + $0x8] sm:$0xff] (!%p239_p2)  }
   0x6   : > { %242 = sbr.rel (%p239_p2) target bundleno = 724 (0x2d4), region = 48  ;;  %1030 = vmatprep.subr.msk.bf16.mxu0 (!%p239_p2), %vm340_vm0, %v307_v0  ;;  %v342_v1 = vsel (!%p239_p2), %vm340_vm0, %v307_v0, 0  ;;  %p271_p3 = scmp.lt.s32.totalorder (!%p239_p2), %s888_s28, 31  ;;  %1031 = vmatprep.subr.msk.bf16.mxu1 (!%p239_p2), %vm340_vm0, %v307_v0  ;;  %v1040_v26 = vld [vmem:[%s1281_s3] sm:$0xff] (!%p239_p2)   ;;  %v1042_v28 = vld [vmem:[%s1281_s3 + $0x10] sm:$0xff] (!%p239_p2)   ;;  %v1043_v29 = vld [vmem:[%s1281_s3 + $0x18] sm:$0xff] (!%p239_p2)  }
   0x7   : > { %963 = vmatpush3.bf16.msra.mxu0 (!%p239_p2), %v342_v1  ;;  %1029 = vmatpush3.bf16.msra.mxu1 (!%p239_p2), %v342_v1  ;;  %v892_v30 = vld [vmem:[%s1280_s2] ss:$0 sm:$0xff] (!%p239_p2)  ;;  %vm504_vm2 = vcmask (!%p239_p2), 523264   ;;  %vm810_vm3 = vcmask (!%p239_p2), 39936  }
   0x8   : > { %980 = vmatprep.subr.bf16.mxu1 (!%p239_p2), %v1040_v26 }
   0xd   : > { %s1287_s28 = smov (!%p271_p3, %s888_s28), 31 }
   0xe   : > { %s889_s29 = sshll.u32 %s1287_s28, 3 }
   0xf   : > { %s274_s9 = scalar_lea.vmem %s1278_s0, %s889_s29  ;;  %s1241_s14 = scalar_lea.vmem %s1285_s7, %s889_s29 }
  0x10   : > { %v283_v2 = vld [vmem:[%s274_s9] sm:$0xff]  ;;  %v284_v3 = vld [vmem:[%s274_s9 + $0x8] sm:$0xff]  ;;  %v285_v4 = vld [vmem:[%s274_s9 + $0x10] sm:$0xff] }
  0x11   : > { %v299_v5 = vpack.c.bf16 %v284_v3, %v283_v2  ;;  %v286_v6 = vld [vmem:[%s274_s9 + $0x18] sm:$0xff]  ;;  %v287_v7 = vld [vmem:[%s274_s9 + $0x20] sm:$0xff]  ;;  %v288_v8 = vld [vmem:[%s274_s9 + $0x28] sm:$0xff] }
  0x12   : > { %v300_v9 = vpack.c.bf16 %v286_v6, %v285_v4  ;;  %v301_v10 = vpack.c.bf16 %v288_v8, %v287_v7  ;;  %v291_v11 = vld [vmem:[%s274_s9 + $0x40] sm:$0xff]  ;;  %v292_v12 = vld [vmem:[%s274_s9 + $0x48] sm:$0xff]  ;;  %v293_v13 = vld [vmem:[%s274_s9 + $0x50] sm:$0xff] }
  0x13   : > { %964 = vmatprep.mubr.msk.bf16.mxu0 %vm315_vm1, %v299_v5  ;;  %v294_v14 = vld [vmem:[%s274_s9 + $0x58] sm:$0xff]  ;;  %v303_v15 = vpack.c.bf16 %v292_v12, %v291_v11  ;;  %v295_v17 = vld [vmem:[%s274_s9 + $0x60] sm:$0xff]  ;;  %v296_v18 = vld [vmem:[%s274_s9 + $0x68] sm:$0xff] }
  0x14   : > { %965 = vmatmul.mubr.msk.bf16.vlgmr.msra.gmra.mrb[0].mxu0 %vm315_vm1, %v300_v9  ;;  %v304_v16 = vpack.c.bf16 %v294_v14, %v293_v13  ;;  %v289_v19 = vld [vmem:[%s274_s9 + $0x30] sm:$0xff]  ;;  %v290_v20 = vld [vmem:[%s274_s9 + $0x38] sm:$0xff]  ;;  %v305_v21 = vpack.c.bf16 %v296_v18, %v295_v17 }
  0x15   : > { %968 = vmatprep.mubr.msk.bf16.mxu0 %vm315_vm1, %v301_v10  ;;  %972 = vmatprep.mubr.msk.bf16.mxu1 %vm315_vm1, %v303_v15  ;;  %v302_v22 = vpack.c.bf16 %v290_v20, %v289_v19  ;;  %v297_v23 = vld [vmem:[%s274_s9 + $0x70] sm:$0xff]  ;;  %v298_v24 = vld [vmem:[%s274_s9 + $0x78] sm:$0xff] }
  0x16   : > { %973 = vmatmul.mubr.msk.bf16.vlgmr.msra.gmra.mrb[0].mxu1 %vm315_vm1, %v304_v16  ;;  %v306_v25 = vpack.c.bf16 %v298_v24, %v297_v23  ;;  %v1044_v23 = vld [vmem:[%s1283_s5] sm:$0xff]   ;;  %v1045_v24 = vld [vmem:[%s1283_s5 + $0x8] sm:$0xff]  }
  0x17   : > { %976 = vmatprep.mubr.msk.bf16.mxu1 %vm315_vm1, %v305_v21  ;;  %981 = vmatpush3.bf16.msra.mxu1 %v1040_v26  ;;  %v1047_v26 = vld [vmem:[%s1283_s5 + $0x18] sm:$0xff]  }
  0x18   : > { %982 = vmatprep.subr.bf16.mxu1 %v1041_v27  ;;  %1004 = vmatprep.subr.bf16.mxu0 %v1044_v23 }
  0x19   : > { %1005 = vmatpush3.bf16.msra.mxu0 %v1044_v23 }
  0x1a   : > { %1006 = vmatprep.subr.bf16.mxu0 %v1045_v24 }
  0x1b   : > { %983 = vmatpush3.bf16.msra.mxu1 %v1041_v27  ;;  %v901_v27 = vld [vmem:[%s1282_s4] ss:$0 sm:$0xff] }
  0x1c   : > { %969 = vmatmul.mubr.msk.bf16.gmra.mrb[4].mxu0 %vm315_vm1, %v302_v22  ;;  %984 = vmatprep.subr.bf16.mxu1 %v1042_v28 }
  0x1d   : > { %1007 = vmatpush3.bf16.msra.mxu0 %v1045_v24 }
  0x1e   : > { %977 = vmatmul.mubr.msk.bf16.gmra.mrb[4].mxu1 %vm315_vm1, %v306_v25  ;;  %v1046_v25 = vld [vmem:[%s1283_s5 + $0x10] sm:$0xff]  }
  0x1f   : > { %985 = vmatpush3.bf16.msra.mxu1 %v1042_v28  ;;  %1008 = vmatprep.subr.bf16.mxu0 %v1046_v25 }
  0x20   : > { %986 = vmatprep.subr.bf16.mxu1 %v1043_v29 }
  0x21   : > { %1009 = vmatpush3.bf16.msra.mxu0 %v1046_v25 }
  0x22   : > { %1010 = vmatprep.subr.bf16.mxu0 %v1047_v26 }
  0x23   : > { %987 = vmatpush3.bf16.msra.mxu1 %v1043_v29 }
  0x25   : > { %1011 = vmatpush3.bf16.msra.mxu0 %v1047_v26 }
  0xe7   : > { %v966_v31 = vpop.f32.mrb[0].mxu0 }
  0xe8   : > { %v387_v32 = vadd.f32 %v966_v31, %v892_v30  ;;  %v378_v33 = vpop.f32.mrb[1].mxu0 }
  0xe9   : > { %v379_v34 = vadd.f32 %v892_v30, %v378_v33  ;;  %v967_v35 = vpop.f32.mrb[2].mxu0  ;;  %v974_v38 = vpop.f32.mrb[0].mxu1 }
  0xea   : > { %1048 = vtanh.f32 %v387_v32  ;;  %v390_v36 = vadd.f32 %v967_v35, %v892_v30  ;;  %v381_v37 = vpop.f32.mrb[3].mxu0  ;;  %v419_v40 = vadd.f32 %v974_v38, %v892_v30  ;;  %v410_v41 = vpop.f32.mrb[1].mxu1 }
  0xeb   : > { %1050 = vtanh.f32 %v379_v34  ;;  %v382_v39 = vadd.f32 %v892_v30, %v381_v37  ;;  %v411_v42 = vadd.f32 %v892_v30, %v410_v41  ;;  %v975_v43 = vpop.f32.mrb[2].mxu1 }
  0xec   : > { %1052 = vtanh.f32 %v390_v36  ;;  %v422_v44 = vadd.f32 %v975_v43, %v892_v30  ;;  %v413_v45 = vpop.f32.mrb[3].mxu1 }
  0xed   : > { %1054 = vtanh.f32 %v382_v39  ;;  %v414_v46 = vadd.f32 %v892_v30, %v413_v45 }
  0xee   : > { %1056 = vtanh.f32 %v419_v40 }
  0xef   : > { %v970_v47 = vpop.f32.mrb[4].mxu0  ;;  %1058 = vtanh.f32 %v411_v42 }
  0xf0   : > { %v403_v48 = vadd.f32 %v970_v47, %v892_v30  ;;  %v394_v49 = vpop.f32.mrb[5].mxu0  ;;  %1060 = vtanh.f32 %v422_v44 }
  0xf1   : > { %v395_v50 = vadd.f32 %v892_v30, %v394_v49  ;;  %v971_v51 = vpop.f32.mrb[6].mxu0  ;;  %1062 = vtanh.f32 %v414_v46  ;;  %v978_v54 = vpop.f32.mrb[4].mxu1 }
  0xf2   : > { %1064 = vtanh.f32 %v403_v48  ;;  %v406_v52 = vadd.f32 %v971_v51, %v892_v30  ;;  %v397_v53 = vpop.f32.mrb[7].mxu0  ;;  %v435_v56 = vadd.f32 %v978_v54, %v892_v30  ;;  %v426_v57 = vpop.f32.mrb[5].mxu1 }
  0xf3   : > { %1066 = vtanh.f32 %v395_v50  ;;  %v398_v55 = vadd.f32 %v892_v30, %v397_v53  ;;  %v427_v59 = vadd.f32 %v892_v30, %v426_v57  ;;  %v979_v60 = vpop.f32.mrb[6].mxu1 }
  0xf4   : > { %v1049_v58 = vpop.eup %1048  ;;  %1068 = vtanh.f32 %v406_v52  ;;  %v438_v62 = vadd.f32 %v979_v60, %v892_v30  ;;  %v429_v63 = vpop.f32.mrb[7].mxu1 }
  0xf5   : > { %v1051_v61 = vpop.eup %1050  ;;  %1070 = vtanh.f32 %v398_v55  ;;  %v430_v1 = vadd.f32 %v892_v30, %v429_v63 }
  0xf6   : > { %v1053_v0 = vpop.eup %1052  ;;  %1072 = vtanh.f32 %v435_v56 }
  0xf7   : > { %v1055_v2 = vpop.eup %1054  ;;  %v458_v3 = vpack.c.bf16 %v1053_v0, %v1049_v58  ;;  %1074 = vtanh.f32 %v427_v59 }
  0xf8   : > { %v1057_v4 = vpop.eup %1056  ;;  %v457_v5 = vpack.c.bf16 %v1055_v2, %v1051_v61  ;;  %1076 = vtanh.f32 %v438_v62 }
  0xf9   : > { %v1059_v6 = vpop.eup %1058  ;;  %1078 = vtanh.f32 %v430_v1 }
  0xfa   : > { %v1061_v7 = vpop.eup %1060  ;;  %988 = vmatprep.mubr.msk.bf16.mxu1 %vm504_vm2, %v457_v5 }
  0xfb   : > { %v1063_v8 = vpop.eup %1062  ;;  %989 = vmatmul.mubr.msk.bf16.vlgmr.msra.gmra.mrb[8].mxu1 %vm504_vm2, %v458_v3  ;;  %v462_v9 = vpack.c.bf16 %v1061_v7, %v1057_v4 }
  0xfc   : > { %v1065_v10 = vpop.eup %1064  ;;  %v461_v11 = vpack.c.bf16 %v1063_v8, %v1059_v6 }
  0xfd   : > { %v1067_v12 = vpop.eup %1066 }
  0xfe   : > { %v1069_v13 = vpop.eup %1068 }
  0xff   : > { %v1071_v14 = vpop.eup %1070  ;;  %v460_v15 = vpack.c.bf16 %v1069_v13, %v1065_v10 }
 0x100   : > { %v1073_v16 = vpop.eup %1072  ;;  %v459_v17 = vpack.c.bf16 %v1071_v14, %v1067_v12 }
 0x101   : > { %v1075_v18 = vpop.eup %1074 }
 0x102   : > { %v1077_v19 = vpop.eup %1076  ;;  %992 = vmatprep.mubr.msk.bf16.mxu1 %vm504_vm2, %v459_v17 }
 0x103   : > { %v1079_v20 = vpop.eup %1078  ;;  %993 = vmatmul.mubr.msk.bf16.gmra.mrb[12].mxu1 %vm504_vm2, %v460_v15  ;;  %v464_v21 = vpack.c.bf16 %v1077_v19, %v1073_v16 }
 0x104   : > { %996 = vmatprep.mubr.msk.bf16.mxu1 %vm504_vm2, %v461_v11  ;;  %v463_v22 = vpack.c.bf16 %v1079_v20, %v1075_v18  ;;  %v914_v20 = vld [vmem:[%s1284_s6] ss:$0 sm:$0xff] }
 0x10b   : > { %997 = vmatmul.mubr.msk.bf16.gmra.mrb[16].mxu1 %vm504_vm2, %v462_v9 }
 0x10c   : > { %1000 = vmatprep.mubr.msk.bf16.mxu1 %vm504_vm2, %v463_v22 }
 0x113   : > { %1001 = vmatmul.mubr.msk.bf16.gmra.mrb[20].mxu1 %vm504_vm2, %v464_v21 }
 0x1ce   : > { %v990_v28 = vpop.f32.mrb[8].mxu1 }
 0x1cf   : > { %v572_v29 = vadd.f32 %v990_v28, %v901_v27  ;;  %v563_v30 = vpop.f32.mrb[9].mxu1 }
 0x1d0   : > { %v564_v31 = vadd.f32 %v901_v27, %v563_v30  ;;  %v991_v32 = vpop.f32.mrb[10].mxu1 }
 0x1d1   : > { %1080 = vtanh.f32 %v572_v29  ;;  %v575_v33 = vadd.f32 %v991_v32, %v901_v27  ;;  %v566_v34 = vpop.f32.mrb[11].mxu1 }
 0x1d2   : > { %1082 = vtanh.f32 %v564_v31  ;;  %v567_v35 = vadd.f32 %v901_v27, %v566_v34 }
 0x1d3   : > { %1084 = vtanh.f32 %v575_v33 }
 0x1d4   : > { %1086 = vtanh.f32 %v567_v35 }
 0x1d6   : > { %v994_v36 = vpop.f32.mrb[12].mxu1 }
 0x1d7   : > { %v588_v37 = vadd.f32 %v994_v36, %v901_v27  ;;  %v579_v38 = vpop.f32.mrb[13].mxu1 }
 0x1d8   : > { %v580_v39 = vadd.f32 %v901_v27, %v579_v38  ;;  %v995_v40 = vpop.f32.mrb[14].mxu1 }
 0x1d9   : > { %1088 = vtanh.f32 %v588_v37  ;;  %v591_v41 = vadd.f32 %v995_v40, %v901_v27  ;;  %v582_v42 = vpop.f32.mrb[15].mxu1 }
 0x1da   : > { %1090 = vtanh.f32 %v580_v39  ;;  %v583_v43 = vadd.f32 %v901_v27, %v582_v42 }
 0x1db   : > { %v1081_v44 = vpop.eup %1080  ;;  %1092 = vtanh.f32 %v591_v41 }
 0x1dc   : > { %v1083_v45 = vpop.eup %1082  ;;  %1094 = vtanh.f32 %v583_v43 }
 0x1dd   : > { %v1085_v46 = vpop.eup %1084 }
 0x1de   : > { %v1087_v47 = vpop.eup %1086  ;;  %v643_v48 = vpack.c.bf16 %v1085_v46, %v1081_v44  ;;  %v998_v49 = vpop.f32.mrb[16].mxu1 }
 0x1df   : > { %v604_v50 = vadd.f32 %v998_v49, %v901_v27  ;;  %v595_v51 = vpop.f32.mrb[17].mxu1  ;;  %v642_v52 = vpack.c.bf16 %v1087_v47, %v1083_v45 }
 0x1e0   : > { %v596_v53 = vadd.f32 %v901_v27, %v595_v51  ;;  %v999_v54 = vpop.f32.mrb[18].mxu1 }
 0x1e1   : > { %1096 = vtanh.f32 %v604_v50  ;;  %v607_v55 = vadd.f32 %v999_v54, %v901_v27  ;;  %v598_v56 = vpop.f32.mrb[19].mxu1  ;;  %1012 = vmatprep.mubr.msk.bf16.mxu0 %vm504_vm2, %v642_v52 }
 0x1e2   : > { %1098 = vtanh.f32 %v596_v53  ;;  %v599_v57 = vadd.f32 %v901_v27, %v598_v56  ;;  %1013 = vmatmul.mubr.msk.bf16.vlgmr.msra.gmra.mrb[8].mxu0 %vm504_vm2, %v643_v48 }
 0x1e3   : > { %v1089_v58 = vpop.eup %1088  ;;  %1100 = vtanh.f32 %v607_v55 }
 0x1e4   : > { %v1091_v59 = vpop.eup %1090  ;;  %1102 = vtanh.f32 %v599_v57 }
 0x1e5   : > { %v1093_v60 = vpop.eup %1092 }
 0x1e6   : > { %v1095_v61 = vpop.eup %1094  ;;  %v1002_v62 = vpop.f32.mrb[20].mxu1  ;;  %v645_v63 = vpack.c.bf16 %v1093_v60, %v1089_v58 }
 0x1e7   : > { %v620_v0 = vadd.f32 %v1002_v62, %v901_v27  ;;  %v611_v1 = vpop.f32.mrb[21].mxu1  ;;  %v644_v2 = vpack.c.bf16 %v1095_v61, %v1091_v59 }
 0x1e8   : > { %v612_v3 = vadd.f32 %v901_v27, %v611_v1  ;;  %v1003_v4 = vpop.f32.mrb[22].mxu1 }
 0x1e9   : > { %1104 = vtanh.f32 %v620_v0  ;;  %v623_v5 = vadd.f32 %v1003_v4, %v901_v27  ;;  %v614_v6 = vpop.f32.mrb[23].mxu1  ;;  %1016 = vmatprep.mubr.msk.bf16.mxu0 %vm504_vm2, %v644_v2 }
 0x1ea   : > { %1106 = vtanh.f32 %v612_v3  ;;  %v615_v7 = vadd.f32 %v901_v27, %v614_v6  ;;  %1017 = vmatmul.mubr.msk.bf16.gmra.mrb[12].mxu0 %vm504_vm2, %v645_v63 }
 0x1eb   : > { %v1097_v8 = vpop.eup %1096  ;;  %1108 = vtanh.f32 %v623_v5 }
 0x1ec   : > { %v1099_v9 = vpop.eup %1098  ;;  %1110 = vtanh.f32 %v615_v7 }
 0x1ed   : > { %v1101_v10 = vpop.eup %1100 }
 0x1ee   : > { %v1103_v11 = vpop.eup %1102  ;;  %v647_v12 = vpack.c.bf16 %v1101_v10, %v1097_v8 }
 0x1ef   : > { %v646_v13 = vpack.c.bf16 %v1103_v11, %v1099_v9 }
 0x1f1   : > { %1020 = vmatprep.mubr.msk.bf16.mxu0 %vm504_vm2, %v646_v13 }
 0x1f2   : > { %1021 = vmatmul.mubr.msk.bf16.gmra.mrb[16].mxu0 %vm504_vm2, %v647_v12 }
 0x1f3   : > { %v1105_v14 = vpop.eup %1104 }
 0x1f4   : > { %v1107_v15 = vpop.eup %1106 }
 0x1f5   : > { %v1109_v16 = vpop.eup %1108 }
 0x1f6   : > { %v1111_v17 = vpop.eup %1110  ;;  %v649_v18 = vpack.c.bf16 %v1109_v16, %v1105_v14 }
 0x1f7   : > { %v648_v19 = vpack.c.bf16 %v1111_v17, %v1107_v15 }
 0x1f9   : > { %1024 = vmatprep.mubr.msk.bf16.mxu0 %vm504_vm2, %v648_v19 }
 0x1fa   : > { %1025 = vmatmul.mubr.msk.bf16.gmra.mrb[20].mxu0 %vm504_vm2, %v649_v18 }
 0x2b5   : > { %v1014_v21 = vpop.f32.mrb[8].mxu0 }
 0x2b6   : > { %v756_v22 = vadd.f32 %v1014_v21, %v914_v20  ;;  %v747_v23 = vpop.f32.mrb[9].mxu0 }
 0x2b7   : > { %v748_v24 = vadd.f32 %v914_v20, %v747_v23  ;;  %v1015_v25 = vpop.f32.mrb[10].mxu0 }
 0x2b8   : > { %813 = vst.msk [vmem:[%s1241_s14 + $0x10] sm:$0xff] %vm810_vm3, %v756_v22  ;;  %v759_v26 = vadd.f32 %v1015_v25, %v914_v20  ;;  %v750_v27 = vpop.f32.mrb[11].mxu0 }
 0x2b9   : > { %811 = vst.msk [vmem:[%s1241_s14] sm:$0xff] %vm810_vm3, %v748_v24  ;;  %v751_v28 = vadd.f32 %v914_v20, %v750_v27 }
 0x2ba   : > { %814 = vst.msk [vmem:[%s1241_s14 + $0x18] sm:$0xff] %vm810_vm3, %v759_v26 }
 0x2bb   : > { %812 = vst.msk [vmem:[%s1241_s14 + $0x8] sm:$0xff] %vm810_vm3, %v751_v28 }
 0x2bd   : > { %v1018_v29 = vpop.f32.mrb[12].mxu0 }
 0x2be   : > { %v772_v30 = vadd.f32 %v1018_v29, %v914_v20  ;;  %v763_v31 = vpop.f32.mrb[13].mxu0 }
 0x2bf   : > { %v764_v32 = vadd.f32 %v914_v20, %v763_v31  ;;  %v1019_v33 = vpop.f32.mrb[14].mxu0 }
 0x2c0   : > { %817 = vst.msk [vmem:[%s1241_s14 + $0x30] sm:$0xff] %vm810_vm3, %v772_v30  ;;  %v775_v34 = vadd.f32 %v1019_v33, %v914_v20  ;;  %v766_v35 = vpop.f32.mrb[15].mxu0 }
 0x2c1   : > { %815 = vst.msk [vmem:[%s1241_s14 + $0x20] sm:$0xff] %vm810_vm3, %v764_v32  ;;  %v767_v36 = vadd.f32 %v914_v20, %v766_v35 }
 0x2c2   : > { %818 = vst.msk [vmem:[%s1241_s14 + $0x38] sm:$0xff] %vm810_vm3, %v775_v34 }
 0x2c3   : > { %816 = vst.msk [vmem:[%s1241_s14 + $0x28] sm:$0xff] %vm810_vm3, %v767_v36 }
 0x2c5   : > { %v1022_v37 = vpop.f32.mrb[16].mxu0 }
 0x2c6   : > { %v788_v38 = vadd.f32 %v1022_v37, %v914_v20  ;;  %v779_v39 = vpop.f32.mrb[17].mxu0 }
 0x2c7   : > { %v780_v40 = vadd.f32 %v914_v20, %v779_v39  ;;  %v1023_v41 = vpop.f32.mrb[18].mxu0 }
 0x2c8   : > { %821 = vst.msk [vmem:[%s1241_s14 + $0x50] sm:$0xff] %vm810_vm3, %v788_v38  ;;  %v791_v42 = vadd.f32 %v1023_v41, %v914_v20  ;;  %v782_v43 = vpop.f32.mrb[19].mxu0 }
 0x2c9   : > { %819 = vst.msk [vmem:[%s1241_s14 + $0x40] sm:$0xff] %vm810_vm3, %v780_v40  ;;  %v783_v44 = vadd.f32 %v914_v20, %v782_v43 }
 0x2ca   : > { %822 = vst.msk [vmem:[%s1241_s14 + $0x58] sm:$0xff] %vm810_vm3, %v791_v42 }
 0x2cb   : > { %820 = vst.msk [vmem:[%s1241_s14 + $0x48] sm:$0xff] %vm810_vm3, %v783_v44 }
 0x2cd   : > { %v1026_v45 = vpop.f32.mrb[20].mxu0 }
 0x2ce   : > { %v804_v46 = vadd.f32 %v1026_v45, %v914_v20  ;;  %v795_v47 = vpop.f32.mrb[21].mxu0 }
 0x2cf   : > { %v796_v48 = vadd.f32 %v914_v20, %v795_v47  ;;  %v1027_v49 = vpop.f32.mrb[22].mxu0 }
 0x2d0   : > { %825 = vst.msk [vmem:[%s1241_s14 + $0x70] sm:$0xff] %vm810_vm3, %v804_v46  ;;  %v807_v50 = vadd.f32 %v1027_v49, %v914_v20  ;;  %v798_v51 = vpop.f32.mrb[23].mxu0 }
 0x2d1   : > { %823 = vst.msk [vmem:[%s1241_s14 + $0x60] sm:$0xff] %vm810_vm3, %v796_v48  ;;  %v799_v52 = vadd.f32 %v914_v20, %v798_v51 }
 0x2d2   : > { %826 = vst.msk [vmem:[%s1241_s14 + $0x78] sm:$0xff] %vm810_vm3, %v807_v50 }
 0x2d3   : > { %824 = vst.msk [vmem:[%s1241_s14 + $0x68] sm:$0xff] %vm810_vm3, %v799_v52 }
 0x2d4 PF: > { %s17_s24 = sadd.s32 1, %s1118_s24  }
 0x2d5   : > { %p14_p4 = scmp.ge.s32.totalorder %s17_s24, 4  }
 0x2d7   :  { %16 = sbr.rel (!%p14_p4) target bundleno = 1 (0x1), region = 78 }

</bundles_post_ra>
